<compile_context>
chip_gen: v5e
topology: v5e:2x2
jax: 0.10.0
libtpu: 0.0.40
codegen_flags: <defaults>
</compile_context>

<pallas_src>
import functools

import jax
import jax.numpy as jnp
from jax.experimental import pallas as pl
from jax.experimental.pallas import tpu as pltpu


def _traj_cost_kernel(ee_pos_ref, ee_rot_ref, o_t_g_ref, g_rot_ref, disc_ref,
                      *out_refs, weight, vec_weight, hinge_val, convergence_val):
    f32 = jnp.float32
    rw = [float(v) for v in vec_weight[0:3]]
    pw = [float(v) for v in vec_weight[3:6]]
    emit_aux = len(out_refs) == 3

    bshape = ee_pos_ref.shape[1:]                 # (H, TB)

    ep = [ee_pos_ref[k] for k in range(3)]        # (H, TB)
    er = [ee_rot_ref[j] for j in range(9)]        # (H, TB), j = k*3 + a
    otg = [o_t_g_ref[k] for k in range(3)]        # (H, 1): -(g_R^T g_p)[a], precomputed

    # Hoist/CSE the lane-broadcast of the 9 resident goal-rotation planes: each
    # one is reused 3x in the contraction below and JAX does not CSE
    # broadcast_in_dim, so broadcast exactly once per plane here.
    grb = [jnp.broadcast_to(g_rot_ref[j], bshape) for j in range(9)]

    # ---- position error: ee_t_g[a] = (ee_R.T @ ee_p)[a] + o_t_g[a] ----------
    pos_err = None
    for a in range(3):
        t_ee = er[a] * ep[0] + er[3 + a] * ep[1] + er[6 + a] * ep[2]
        d = f32(pw[a]) * (t_ee + otg[a])
        pos_err = d * d if pos_err is None else pos_err + d * d
    goal_dist = jnp.sqrt(pos_err)                 # == torch.norm(pos_w * ee_t_g)

    # ---- rotation error: R_err = goal_R.T @ ee_R, per-row norms of (I - R_err)
    rot_sum = None
    rot_nsq = None
    for a in range(3):
        g0, g1, g2 = grb[a], grb[3 + a], grb[6 + a]
        row_sq = None
        for b in range(3):
            R_ab = g0 * er[b] + g1 * er[3 + b] + g2 * er[6 + b]
            e = (1.0 - R_ab) if a == b else (0.0 - R_ab)
            row_sq = e * e if row_sq is None else row_sq + e * e
        r_a = jnp.sqrt(row_sq)                    # torch.norm(I - R_err, dim=-1)[a]
        wr = f32(rw[a]) * r_a
        rot_sum = wr if rot_sum is None else rot_sum + wr
        if emit_aux:
            rot_nsq = wr * wr if rot_nsq is None else rot_nsq + wr * wr

    # sqrt(rot_err) == |rot_sum| (rot_err = rot_sum**2); hinge/convergence gates
    # specialized at trace time (the common convergence_val=(0,0) path emits no
    # selects).  GaussianProjection with empty gaussian_params is the identity.
    zero = f32(0.0)
    sqrt_rot = jnp.abs(rot_sum)
    if hinge_val > 0.0:
        sqrt_rot = jnp.where(goal_dist <= f32(hinge_val), sqrt_rot, zero)
    if convergence_val[0] > 0.0:
        sqrt_rot = jnp.where(sqrt_rot * sqrt_rot < f32(convergence_val[0]), zero, sqrt_rot)
    sqrt_pos = goal_dist                          # sqrt(pos_err) == goal_dist
    if convergence_val[1] > 0.0:
        sqrt_pos = jnp.where(pos_err < f32(convergence_val[1]), zero, sqrt_pos)

    cost = f32(weight[0]) * sqrt_rot + f32(weight[1]) * sqrt_pos
    out_refs[0][...] = cost * disc_ref[...]       # (H,1) discount lane-broadcast
    if emit_aux:
        out_refs[1][...] = jnp.sqrt(rot_nsq)      # rot_err_norm
        out_refs[2][...] = goal_dist


def _match_horizon(goal_pos, goal_rot, horizon):
    G = goal_pos.shape[0]
    if G > horizon:
        return goal_pos[:horizon], goal_rot[:horizon]
    if G < horizon:
        reps = horizon - G
        goal_pos = jnp.concatenate(
            [goal_pos, jnp.tile(goal_pos[-1:], (reps, 1))], axis=0)
        goal_rot = jnp.concatenate(
            [goal_rot, jnp.tile(goal_rot[-1:], (reps, 1, 1))], axis=0)
    return goal_pos, goal_rot


def _pick_batch_tiling(B, H, n_out, vmem_budget_bytes=8 << 20):
    """Lane-chunk width TB (multiple of 128) and grid length nb.

    TB is VMEM-budgeted (double-buffered pipeline blocks + ~18 elementwise
    temporaries per lane column) and capped at 2048 lanes; the grid keeps >=2
    (preferably even) steps when the batch allows so both v7x TensorCores get
    balanced work.
    """
    LANE = 128
    lane_groups = -(-B // LANE)
    per_lane_bytes = ((12 + n_out) * 2 + 18) * H * 4
    max_groups = max(1, vmem_budget_bytes // (per_lane_bytes * LANE))
    max_groups = min(max_groups, 16)                      # TB <= 2048 lanes
    if lane_groups > 1:                                   # keep >= 2 grid steps
        max_groups = min(max_groups, max(1, lane_groups // 2))
    chunk_groups = max(1, min(max_groups, lane_groups))
    nb = -(-lane_groups // chunk_groups)
    if nb > 1 and nb % 2 == 1:                            # prefer even nb (v7x balance)
        cg2 = -(-lane_groups // (nb + 1))
        if cg2 >= 1 and (-(-lane_groups // cg2)) % 2 == 0:
            chunk_groups = cg2
            nb = -(-lane_groups // chunk_groups)
    chunk_groups = -(-lane_groups // nb)                  # shrink tail padding
    nb = -(-lane_groups // chunk_groups)
    return chunk_groups * LANE, nb


class TrajectoryCostPallas:
    def __init__(self, weight, discount=1.0, vec_weight=(1.0,) * 6,
                 hinge_val=100.0, convergence_val=(0.0, 0.0),
                 return_aux=True, output_layout="bh"):
        assert output_layout in ("bh", "hb")
        self.weight = tuple(float(w) for w in weight)
        self.discount = float(discount)
        self.vec_weight = tuple(float(v) for v in vec_weight)
        self.hinge_val = float(hinge_val)
        self.convergence_val = tuple(float(c) for c in convergence_val)
        self.return_aux = bool(return_aux)
        self.output_layout = output_layout

    @staticmethod
    def pack_inputs(ee_pos_batch, ee_rot_batch):
        """Producer-side relayout (B,H,3)/(B,H,3,3) -> (3,H,B)/(9,H,B).

        Call this at the producer (or fuse it into the FK/rollout) and pass the
        results with inputs_packed=True to keep the hot loop free of the extra
        HBM round trip the relayout otherwise costs.
        """
        f32 = jnp.float32
        B, H, _ = ee_pos_batch.shape
        pos = jnp.transpose(ee_pos_batch.astype(f32), (2, 1, 0))                     # (3,H,B)
        rot = jnp.transpose(ee_rot_batch.astype(f32), (2, 3, 1, 0)).reshape(9, H, B)  # (9,H,B)
        return pos, rot

    def __call__(self, ee_pos_batch, ee_rot_batch, ee_goal_pos_traj, ee_goal_rot_traj,
                 inputs_packed=False):
        f32 = jnp.float32
        if inputs_packed:
            ee_pos_l = ee_pos_batch.astype(f32)           # (3, H, B)
            ee_rot_l = ee_rot_batch.astype(f32)           # (9, H, B)
            _, H, B = ee_pos_l.shape
        else:
            B, H, _ = ee_pos_batch.shape
            # TODO(synk): this relayout is one extra HBM round trip around an
            # HBM-bound kernel; have the producer emit the packed layout.
            ee_pos_l, ee_rot_l = self.pack_inputs(ee_pos_batch, ee_rot_batch)

        g_pos, g_rot = _match_horizon(ee_goal_pos_traj.astype(f32),
                                      ee_goal_rot_traj.astype(f32), H)

        n_out = 3 if self.return_aux else 1
        TB, nb = _pick_batch_tiling(B, H, n_out)
        B_pad = nb * TB
        if B_pad != B:
            pad = ((0, 0), (0, 0), (0, B_pad - B))
            ee_pos_l = jnp.pad(ee_pos_l, pad)
            ee_rot_l = jnp.pad(ee_rot_l, pad)

        # Tiny resident goal-side blocks (lane-broadcast inside the kernel).
        # o_t_g[a,t] = -(goal_R[t]^T goal_p[t])[a]  -- precomputed here so the
        # kernel drops the goal-side contraction entirely.
        o_t_g = (-jnp.einsum("tka,tk->at", g_rot, g_pos))[:, :, None]                 # (3,H,1)
        g_rot_l = jnp.transpose(g_rot, (1, 2, 0)).reshape(9, H)[:, :, None]           # (9,H,1)
        disc = jnp.power(f32(self.discount), jnp.arange(H, dtype=f32))[:, None]       # (H,1)

        kernel = functools.partial(
            _traj_cost_kernel,
            weight=self.weight, vec_weight=self.vec_weight,
            hinge_val=self.hinge_val, convergence_val=self.convergence_val)

        out_shape = tuple(jax.ShapeDtypeStruct((H, B_pad), f32) for _ in range(n_out))
        out_specs = [pl.BlockSpec((H, TB), lambda i: (0, i)) for _ in range(n_out)]

        # Explicit scoped-VMEM limit: double-buffered pipeline blocks + ~20
        # (H,TB) temporaries, 2x margin, clamped to [32 MiB, 48 MiB] (inside
        # physical VMEM on v5e/v6e/v7x).
        vmem_est = ((12 + n_out) * 2 + 20) * H * TB * 4
        vmem_limit = int(min(max(2 * vmem_est, 32 << 20), 48 << 20))

        outs = pl.pallas_call(
            kernel,
            out_shape=out_shape,
            grid_spec=pltpu.PrefetchScalarGridSpec(
                num_scalar_prefetch=0,
                grid=(nb,),
                in_specs=[
                    pl.BlockSpec((3, H, TB), lambda i: (0, 0, i)),
                    pl.BlockSpec((9, H, TB), lambda i: (0, 0, i)),
                    pl.BlockSpec((3, H, 1), lambda i: (0, 0, 0)),   # resident o_t_g
                    pl.BlockSpec((9, H, 1), lambda i: (0, 0, 0)),   # resident goal rot
                    pl.BlockSpec((H, 1), lambda i: (0, 0)),         # resident discount
                ],
                out_specs=out_specs,
            ),
            compiler_params=pltpu.CompilerParams(
                dimension_semantics=("parallel",),
                vmem_limit_bytes=vmem_limit),
        )(ee_pos_l, ee_rot_l, o_t_g, g_rot_l, disc)

        if not isinstance(outs, (tuple, list)):
            outs = (outs,)

        def _unpad(x):
            return x if B_pad == B else x[:, :B]

        if self.output_layout == "hb":
            # lane-dense kernel layout returned as-is (no output transposes)
            res = tuple(_unpad(x) for x in outs)
        else:
            res = tuple(jnp.transpose(_unpad(x), (1, 0)) for x in outs)
        return res if self.return_aux else res[0]


def _reference(ee_pos_batch, ee_rot_batch, goal_pos, goal_rot, *,
               weight, vec_weight, discount, hinge_val, convergence_val):
    """Pure-JAX reference mirroring the PyTorch forward exactly."""
    f32 = jnp.float32
    B, H, _ = ee_pos_batch.shape
    goal_pos, goal_rot = _match_horizon(goal_pos.astype(f32), goal_rot.astype(f32), H)
    rot_w = jnp.asarray(vec_weight[0:3], f32)
    pos_w = jnp.asarray(vec_weight[3:6], f32)

    # R_err[i,t,a,b] = sum_k goal_rot[t,k,a] * ee_rot[i,t,k,b]
    R_err = jnp.sum(goal_rot[None, :, :, :, None] * ee_rot_batch[:, :, :, None, :], axis=2)
    # ee_t_o[i,t,a] = sum_k ee_rot[i,t,k,a] * ee_pos[i,t,k]
    ee_t_o = jnp.sum(ee_rot_batch * ee_pos_batch[..., None], axis=2)
    # o_t_g[t,a] = -sum_k goal_rot[t,k,a] * goal_pos[t,k]
    o_t_g = -jnp.sum(goal_rot * goal_pos[..., None], axis=1)
    ee_t_g = ee_t_o + o_t_g[None]

    goal_dist = jnp.linalg.norm(pos_w * ee_t_g, axis=-1)
    pos_err = jnp.sum(jnp.square(pos_w * ee_t_g), axis=-1)
    rot_res = jnp.linalg.norm(jnp.eye(3, dtype=f32) - R_err, axis=-1)      # (B,H,3)
    rot_err_norm = jnp.linalg.norm(rot_w * rot_res, axis=-1)
    rot_err = jnp.square(jnp.sum(rot_w * rot_res, axis=-1))

    if hinge_val > 0.0:
        rot_err = jnp.where(goal_dist <= hinge_val, rot_err, 0.0)
    rot_err = jnp.where(rot_err < convergence_val[0], 0.0, rot_err)
    pos_err = jnp.where(pos_err < convergence_val[1], 0.0, pos_err)

    cost = weight[0] * jnp.sqrt(rot_err) + weight[1] * jnp.sqrt(pos_err)
    powers = jnp.arange(H, dtype=f32)[None, :]
    return cost * jnp.power(jnp.float32(discount), powers), rot_err_norm, goal_dist


if __name__ == "__main__":
    key = jax.random.PRNGKey(0)
    B, H, G = 2, 8, 5                       # goal traj shorter than horizon -> pad path
    k1, k2, k3, k4 = jax.random.split(key, 4)

    ee_pos_batch = jax.random.normal(k1, (B, H, 3), dtype=jnp.float32)
    ee_rot_batch = jax.random.normal(k2, (B, H, 3, 3), dtype=jnp.float32)
    ee_goal_pos_traj = jax.random.normal(k3, (G, 3), dtype=jnp.float32)
    ee_goal_rot_traj = jax.random.normal(k4, (G, 3, 3), dtype=jnp.float32)

    configs = [
        dict(weight=(1.0, 5.0), vec_weight=(0.5, 0.5, 0.5, 1.0, 1.0, 1.0),
             discount=0.9, hinge_val=100.0, convergence_val=(0.0, 0.0)),
        dict(weight=(2.0, 3.0), vec_weight=(1.0, 0.7, 0.3, 0.9, 1.1, 1.3),
             discount=0.95, hinge_val=2.5, convergence_val=(0.4, 0.3)),
    ]

    # 1) default torch-layout path, full outputs, (B,H) results
    for cfg in configs:
        module = TrajectoryCostPallas(**cfg)
        out = module(ee_pos_batch, ee_rot_batch, ee_goal_pos_traj, ee_goal_rot_traj)
        jax.block_until_ready(out)
        ref = _reference(ee_pos_batch, ee_rot_batch,
                         ee_goal_pos_traj, ee_goal_rot_traj, **cfg)
        for got, exp in zip(out, ref):
            assert got.shape == (B, H)
            assert jnp.allclose(got, exp, atol=1e-5, rtol=1e-5)

    # 2) producer-packed inputs + lane-dense (H,B) outputs (fast path)
    pos_l, rot_l = TrajectoryCostPallas.pack_inputs(ee_pos_batch, ee_rot_batch)
    module_hb = TrajectoryCostPallas(**configs[0], output_layout="hb")
    out_hb = module_hb(pos_l, rot_l, ee_goal_pos_traj, ee_goal_rot_traj,
                       inputs_packed=True)
    jax.block_until_ready(out_hb)
    ref0 = _reference(ee_pos_batch, ee_rot_batch,
                      ee_goal_pos_traj, ee_goal_rot_traj, **configs[0])
    for got, exp in zip(out_hb, ref0):
        assert got.shape == (H, B)
        assert jnp.allclose(got.T, exp, atol=1e-5, rtol=1e-5)

    # 3) cost-only path (aux outputs disabled)
    module_min = TrajectoryCostPallas(**configs[1], return_aux=False)
    out_min = module_min(ee_pos_batch, ee_rot_batch, ee_goal_pos_traj, ee_goal_rot_traj)
    jax.block_until_ready(out_min)
    ref1 = _reference(ee_pos_batch, ee_rot_batch,
                      ee_goal_pos_traj, ee_goal_rot_traj, **configs[1])
    assert out_min.shape == (B, H)
    assert jnp.allclose(out_min, ref1[0], atol=1e-5, rtol=1e-5)

    print("KERNEL_OK")
</pallas_src>

<mosaic_0001>
module attributes {stable_mosaic.version = 11 : i64} {
  func.func @_traj_cost_kernel(%arg0: i32, %arg1: memref<3x8x128xf32, #tpu.memory_space<vmem>>, %arg2: memref<9x8x128xf32, #tpu.memory_space<vmem>>, %arg3: memref<3x8x1xf32, #tpu.memory_space<vmem>>, %arg4: memref<9x8x1xf32, #tpu.memory_space<vmem>>, %arg5: memref<8x1xf32, #tpu.memory_space<vmem>>, %arg6: memref<8x128xf32, #tpu.memory_space<vmem>>, %arg7: memref<8x128xf32, #tpu.memory_space<vmem>>, %arg8: memref<8x128xf32, #tpu.memory_space<vmem>>) attributes {dimension_semantics = [#tpu.dimension_semantics<parallel>], iteration_bounds = array<i64: 1>, scalar_prefetch = 0 : i64, scratch_operands = 0 : i64, tpu.core_type = #tpu.core_type<tc>, window_params = [{transform_indices = @transform_0, window_bounds = array<i64: 3, 8, 128>}, {transform_indices = @transform_1, window_bounds = array<i64: 9, 8, 128>}, {pipeline_mode = #tpu.pipeline_mode<synchronous>, transform_indices = @transform_2, window_bounds = array<i64: 3, 8, 1>}, {pipeline_mode = #tpu.pipeline_mode<synchronous>, transform_indices = @transform_3, window_bounds = array<i64: 9, 8, 1>}, {pipeline_mode = #tpu.pipeline_mode<synchronous>, transform_indices = @transform_4, window_bounds = array<i64: 8, 1>}, {transform_indices = @transform_5, window_bounds = array<i64: 8, 128>}, {transform_indices = @transform_6, window_bounds = array<i64: 8, 128>}, {transform_indices = @transform_7, window_bounds = array<i64: 8, 128>}]} {
    %c0 = arith.constant 0 : index
    %c0_0 = arith.constant 0 : index
    %c0_1 = arith.constant 0 : index
    %0 = vector.load %arg1[%c0, %c0_0, %c0_1] : memref<3x8x128xf32, #tpu.memory_space<vmem>>, vector<1x8x128xf32>
    %1 = vector.shape_cast %0 : vector<1x8x128xf32> to vector<8x128xf32>
    %c1 = arith.constant 1 : index
    %c0_2 = arith.constant 0 : index
    %c0_3 = arith.constant 0 : index
    %2 = vector.load %arg1[%c1, %c0_2, %c0_3] : memref<3x8x128xf32, #tpu.memory_space<vmem>>, vector<1x8x128xf32>
    %3 = vector.shape_cast %2 : vector<1x8x128xf32> to vector<8x128xf32>
    %c2 = arith.constant 2 : index
    %c0_4 = arith.constant 0 : index
    %c0_5 = arith.constant 0 : index
    %4 = vector.load %arg1[%c2, %c0_4, %c0_5] : memref<3x8x128xf32, #tpu.memory_space<vmem>>, vector<1x8x128xf32>
    %5 = vector.shape_cast %4 : vector<1x8x128xf32> to vector<8x128xf32>
    %c0_6 = arith.constant 0 : index
    %c0_7 = arith.constant 0 : index
    %c0_8 = arith.constant 0 : index
    %6 = vector.load %arg2[%c0_6, %c0_7, %c0_8] : memref<9x8x128xf32, #tpu.memory_space<vmem>>, vector<1x8x128xf32>
    %7 = vector.shape_cast %6 : vector<1x8x128xf32> to vector<8x128xf32>
    %c1_9 = arith.constant 1 : index
    %c0_10 = arith.constant 0 : index
    %c0_11 = arith.constant 0 : index
    %8 = vector.load %arg2[%c1_9, %c0_10, %c0_11] : memref<9x8x128xf32, #tpu.memory_space<vmem>>, vector<1x8x128xf32>
    %9 = vector.shape_cast %8 : vector<1x8x128xf32> to vector<8x128xf32>
    %c2_12 = arith.constant 2 : index
    %c0_13 = arith.constant 0 : index
    %c0_14 = arith.constant 0 : index
    %10 = vector.load %arg2[%c2_12, %c0_13, %c0_14] : memref<9x8x128xf32, #tpu.memory_space<vmem>>, vector<1x8x128xf32>
    %11 = vector.shape_cast %10 : vector<1x8x128xf32> to vector<8x128xf32>
    %c3 = arith.constant 3 : index
    %c0_15 = arith.constant 0 : index
    %c0_16 = arith.constant 0 : index
    %12 = vector.load %arg2[%c3, %c0_15, %c0_16] : memref<9x8x128xf32, #tpu.memory_space<vmem>>, vector<1x8x128xf32>
    %13 = vector.shape_cast %12 : vector<1x8x128xf32> to vector<8x128xf32>
    %c4 = arith.constant 4 : index
    %c0_17 = arith.constant 0 : index
    %c0_18 = arith.constant 0 : index
    %14 = vector.load %arg2[%c4, %c0_17, %c0_18] : memref<9x8x128xf32, #tpu.memory_space<vmem>>, vector<1x8x128xf32>
    %15 = vector.shape_cast %14 : vector<1x8x128xf32> to vector<8x128xf32>
    %c5 = arith.constant 5 : index
    %c0_19 = arith.constant 0 : index
    %c0_20 = arith.constant 0 : index
    %16 = vector.load %arg2[%c5, %c0_19, %c0_20] : memref<9x8x128xf32, #tpu.memory_space<vmem>>, vector<1x8x128xf32>
    %17 = vector.shape_cast %16 : vector<1x8x128xf32> to vector<8x128xf32>
    %c6 = arith.constant 6 : index
    %c0_21 = arith.constant 0 : index
    %c0_22 = arith.constant 0 : index
    %18 = vector.load %arg2[%c6, %c0_21, %c0_22] : memref<9x8x128xf32, #tpu.memory_space<vmem>>, vector<1x8x128xf32>
    %19 = vector.shape_cast %18 : vector<1x8x128xf32> to vector<8x128xf32>
    %c7 = arith.constant 7 : index
    %c0_23 = arith.constant 0 : index
    %c0_24 = arith.constant 0 : index
    %20 = vector.load %arg2[%c7, %c0_23, %c0_24] : memref<9x8x128xf32, #tpu.memory_space<vmem>>, vector<1x8x128xf32>
    %21 = vector.shape_cast %20 : vector<1x8x128xf32> to vector<8x128xf32>
    %c8 = arith.constant 8 : index
    %c0_25 = arith.constant 0 : index
    %c0_26 = arith.constant 0 : index
    %22 = vector.load %arg2[%c8, %c0_25, %c0_26] : memref<9x8x128xf32, #tpu.memory_space<vmem>>, vector<1x8x128xf32>
    %23 = vector.shape_cast %22 : vector<1x8x128xf32> to vector<8x128xf32>
    %c0_27 = arith.constant 0 : index
    %c0_28 = arith.constant 0 : index
    %c0_29 = arith.constant 0 : index
    %24 = vector.load %arg3[%c0_27, %c0_28, %c0_29] : memref<3x8x1xf32, #tpu.memory_space<vmem>>, vector<1x8x1xf32>
    %25 = vector.shape_cast %24 : vector<1x8x1xf32> to vector<8x1xf32>
    %c1_30 = arith.constant 1 : index
    %c0_31 = arith.constant 0 : index
    %c0_32 = arith.constant 0 : index
    %26 = vector.load %arg3[%c1_30, %c0_31, %c0_32] : memref<3x8x1xf32, #tpu.memory_space<vmem>>, vector<1x8x1xf32>
    %27 = vector.shape_cast %26 : vector<1x8x1xf32> to vector<8x1xf32>
    %c2_33 = arith.constant 2 : index
    %c0_34 = arith.constant 0 : index
    %c0_35 = arith.constant 0 : index
    %28 = vector.load %arg3[%c2_33, %c0_34, %c0_35] : memref<3x8x1xf32, #tpu.memory_space<vmem>>, vector<1x8x1xf32>
    %29 = vector.shape_cast %28 : vector<1x8x1xf32> to vector<8x1xf32>
    %c0_36 = arith.constant 0 : index
    %c0_37 = arith.constant 0 : index
    %c0_38 = arith.constant 0 : index
    %30 = vector.load %arg4[%c0_36, %c0_37, %c0_38] : memref<9x8x1xf32, #tpu.memory_space<vmem>>, vector<1x8x1xf32>
    %31 = vector.shape_cast %30 : vector<1x8x1xf32> to vector<8x1xf32>
    %32 = vector.shape_cast %31 : vector<8x1xf32> to vector<8x1xf32>
    %33 = vector.broadcast %32 : vector<8x1xf32> to vector<8x128xf32>
    %c1_39 = arith.constant 1 : index
    %c0_40 = arith.constant 0 : index
    %c0_41 = arith.constant 0 : index
    %34 = vector.load %arg4[%c1_39, %c0_40, %c0_41] : memref<9x8x1xf32, #tpu.memory_space<vmem>>, vector<1x8x1xf32>
    %35 = vector.shape_cast %34 : vector<1x8x1xf32> to vector<8x1xf32>
    %36 = vector.shape_cast %35 : vector<8x1xf32> to vector<8x1xf32>
    %37 = vector.broadcast %36 : vector<8x1xf32> to vector<8x128xf32>
    %c2_42 = arith.constant 2 : index
    %c0_43 = arith.constant 0 : index
    %c0_44 = arith.constant 0 : index
    %38 = vector.load %arg4[%c2_42, %c0_43, %c0_44] : memref<9x8x1xf32, #tpu.memory_space<vmem>>, vector<1x8x1xf32>
    %39 = vector.shape_cast %38 : vector<1x8x1xf32> to vector<8x1xf32>
    %40 = vector.shape_cast %39 : vector<8x1xf32> to vector<8x1xf32>
    %41 = vector.broadcast %40 : vector<8x1xf32> to vector<8x128xf32>
    %c3_45 = arith.constant 3 : index
    %c0_46 = arith.constant 0 : index
    %c0_47 = arith.constant 0 : index
    %42 = vector.load %arg4[%c3_45, %c0_46, %c0_47] : memref<9x8x1xf32, #tpu.memory_space<vmem>>, vector<1x8x1xf32>
    %43 = vector.shape_cast %42 : vector<1x8x1xf32> to vector<8x1xf32>
    %44 = vector.shape_cast %43 : vector<8x1xf32> to vector<8x1xf32>
    %45 = vector.broadcast %44 : vector<8x1xf32> to vector<8x128xf32>
    %c4_48 = arith.constant 4 : index
    %c0_49 = arith.constant 0 : index
    %c0_50 = arith.constant 0 : index
    %46 = vector.load %arg4[%c4_48, %c0_49, %c0_50] : memref<9x8x1xf32, #tpu.memory_space<vmem>>, vector<1x8x1xf32>
    %47 = vector.shape_cast %46 : vector<1x8x1xf32> to vector<8x1xf32>
    %48 = vector.shape_cast %47 : vector<8x1xf32> to vector<8x1xf32>
    %49 = vector.broadcast %48 : vector<8x1xf32> to vector<8x128xf32>
    %c5_51 = arith.constant 5 : index
    %c0_52 = arith.constant 0 : index
    %c0_53 = arith.constant 0 : index
    %50 = vector.load %arg4[%c5_51, %c0_52, %c0_53] : memref<9x8x1xf32, #tpu.memory_space<vmem>>, vector<1x8x1xf32>
    %51 = vector.shape_cast %50 : vector<1x8x1xf32> to vector<8x1xf32>
    %52 = vector.shape_cast %51 : vector<8x1xf32> to vector<8x1xf32>
    %53 = vector.broadcast %52 : vector<8x1xf32> to vector<8x128xf32>
    %c6_54 = arith.constant 6 : index
    %c0_55 = arith.constant 0 : index
    %c0_56 = arith.constant 0 : index
    %54 = vector.load %arg4[%c6_54, %c0_55, %c0_56] : memref<9x8x1xf32, #tpu.memory_space<vmem>>, vector<1x8x1xf32>
    %55 = vector.shape_cast %54 : vector<1x8x1xf32> to vector<8x1xf32>
    %56 = vector.shape_cast %55 : vector<8x1xf32> to vector<8x1xf32>
    %57 = vector.broadcast %56 : vector<8x1xf32> to vector<8x128xf32>
    %c7_57 = arith.constant 7 : index
    %c0_58 = arith.constant 0 : index
    %c0_59 = arith.constant 0 : index
    %58 = vector.load %arg4[%c7_57, %c0_58, %c0_59] : memref<9x8x1xf32, #tpu.memory_space<vmem>>, vector<1x8x1xf32>
    %59 = vector.shape_cast %58 : vector<1x8x1xf32> to vector<8x1xf32>
    %60 = vector.shape_cast %59 : vector<8x1xf32> to vector<8x1xf32>
    %61 = vector.broadcast %60 : vector<8x1xf32> to vector<8x128xf32>
    %c8_60 = arith.constant 8 : index
    %c0_61 = arith.constant 0 : index
    %c0_62 = arith.constant 0 : index
    %62 = vector.load %arg4[%c8_60, %c0_61, %c0_62] : memref<9x8x1xf32, #tpu.memory_space<vmem>>, vector<1x8x1xf32>
    %63 = vector.shape_cast %62 : vector<1x8x1xf32> to vector<8x1xf32>
    %64 = vector.shape_cast %63 : vector<8x1xf32> to vector<8x1xf32>
    %65 = vector.broadcast %64 : vector<8x1xf32> to vector<8x128xf32>
    %66 = arith.mulf %7, %1 : vector<8x128xf32>
    %67 = arith.mulf %13, %3 : vector<8x128xf32>
    %68 = arith.addf %66, %67 : vector<8x128xf32>
    %69 = arith.mulf %19, %5 : vector<8x128xf32>
    %70 = arith.addf %68, %69 : vector<8x128xf32>
    %71 = vector.broadcast %25 : vector<8x1xf32> to vector<8x128xf32>
    %72 = arith.addf %70, %71 : vector<8x128xf32>
    %cst = arith.constant 1.000000e+00 : f32
    %73 = vector.broadcast %cst : f32 to vector<8x128xf32>
    %74 = arith.mulf %73, %72 : vector<8x128xf32>
    %75 = arith.mulf %74, %74 : vector<8x128xf32>
    %76 = arith.mulf %9, %1 : vector<8x128xf32>
    %77 = arith.mulf %15, %3 : vector<8x128xf32>
    %78 = arith.addf %76, %77 : vector<8x128xf32>
    %79 = arith.mulf %21, %5 : vector<8x128xf32>
    %80 = arith.addf %78, %79 : vector<8x128xf32>
    %81 = vector.broadcast %27 : vector<8x1xf32> to vector<8x128xf32>
    %82 = arith.addf %80, %81 : vector<8x128xf32>
    %cst_63 = arith.constant 1.000000e+00 : f32
    %83 = vector.broadcast %cst_63 : f32 to vector<8x128xf32>
    %84 = arith.mulf %83, %82 : vector<8x128xf32>
    %85 = arith.mulf %84, %84 : vector<8x128xf32>
    %86 = arith.addf %75, %85 : vector<8x128xf32>
    %87 = arith.mulf %11, %1 : vector<8x128xf32>
    %88 = arith.mulf %17, %3 : vector<8x128xf32>
    %89 = arith.addf %87, %88 : vector<8x128xf32>
    %90 = arith.mulf %23, %5 : vector<8x128xf32>
    %91 = arith.addf %89, %90 : vector<8x128xf32>
    %92 = vector.broadcast %29 : vector<8x1xf32> to vector<8x128xf32>
    %93 = arith.addf %91, %92 : vector<8x128xf32>
    %cst_64 = arith.constant 1.000000e+00 : f32
    %94 = vector.broadcast %cst_64 : f32 to vector<8x128xf32>
    %95 = arith.mulf %94, %93 : vector<8x128xf32>
    %96 = arith.mulf %95, %95 : vector<8x128xf32>
    %97 = arith.addf %86, %96 : vector<8x128xf32>
    %98 = math.sqrt %97 : vector<8x128xf32>
    %99 = arith.mulf %33, %7 : vector<8x128xf32>
    %100 = arith.mulf %45, %13 : vector<8x128xf32>
    %101 = arith.addf %99, %100 : vector<8x128xf32>
    %102 = arith.mulf %57, %19 : vector<8x128xf32>
    %103 = arith.addf %101, %102 : vector<8x128xf32>
    %cst_65 = arith.constant 1.000000e+00 : f32
    %104 = vector.broadcast %cst_65 : f32 to vector<8x128xf32>
    %105 = arith.subf %104, %103 : vector<8x128xf32>
    %106 = arith.mulf %105, %105 : vector<8x128xf32>
    %107 = arith.mulf %33, %9 : vector<8x128xf32>
    %108 = arith.mulf %45, %15 : vector<8x128xf32>
    %109 = arith.addf %107, %108 : vector<8x128xf32>
    %110 = arith.mulf %57, %21 : vector<8x128xf32>
    %111 = arith.addf %109, %110 : vector<8x128xf32>
    %cst_66 = arith.constant 0.000000e+00 : f32
    %112 = vector.broadcast %cst_66 : f32 to vector<8x128xf32>
    %113 = arith.subf %112, %111 : vector<8x128xf32>
    %114 = arith.mulf %113, %113 : vector<8x128xf32>
    %115 = arith.addf %106, %114 : vector<8x128xf32>
    %116 = arith.mulf %33, %11 : vector<8x128xf32>
    %117 = arith.mulf %45, %17 : vector<8x128xf32>
    %118 = arith.addf %116, %117 : vector<8x128xf32>
    %119 = arith.mulf %57, %23 : vector<8x128xf32>
    %120 = arith.addf %118, %119 : vector<8x128xf32>
    %cst_67 = arith.constant 0.000000e+00 : f32
    %121 = vector.broadcast %cst_67 : f32 to vector<8x128xf32>
    %122 = arith.subf %121, %120 : vector<8x128xf32>
    %123 = arith.mulf %122, %122 : vector<8x128xf32>
    %124 = arith.addf %115, %123 : vector<8x128xf32>
    %125 = math.sqrt %124 : vector<8x128xf32>
    %cst_68 = arith.constant 5.000000e-01 : f32
    %126 = vector.broadcast %cst_68 : f32 to vector<8x128xf32>
    %127 = arith.mulf %126, %125 : vector<8x128xf32>
    %128 = arith.mulf %127, %127 : vector<8x128xf32>
    %129 = arith.mulf %37, %7 : vector<8x128xf32>
    %130 = arith.mulf %49, %13 : vector<8x128xf32>
    %131 = arith.addf %129, %130 : vector<8x128xf32>
    %132 = arith.mulf %61, %19 : vector<8x128xf32>
    %133 = arith.addf %131, %132 : vector<8x128xf32>
    %cst_69 = arith.constant 0.000000e+00 : f32
    %134 = vector.broadcast %cst_69 : f32 to vector<8x128xf32>
    %135 = arith.subf %134, %133 : vector<8x128xf32>
    %136 = arith.mulf %135, %135 : vector<8x128xf32>
    %137 = arith.mulf %37, %9 : vector<8x128xf32>
    %138 = arith.mulf %49, %15 : vector<8x128xf32>
    %139 = arith.addf %137, %138 : vector<8x128xf32>
    %140 = arith.mulf %61, %21 : vector<8x128xf32>
    %141 = arith.addf %139, %140 : vector<8x128xf32>
    %cst_70 = arith.constant 1.000000e+00 : f32
    %142 = vector.broadcast %cst_70 : f32 to vector<8x128xf32>
    %143 = arith.subf %142, %141 : vector<8x128xf32>
    %144 = arith.mulf %143, %143 : vector<8x128xf32>
    %145 = arith.addf %136, %144 : vector<8x128xf32>
    %146 = arith.mulf %37, %11 : vector<8x128xf32>
    %147 = arith.mulf %49, %17 : vector<8x128xf32>
    %148 = arith.addf %146, %147 : vector<8x128xf32>
    %149 = arith.mulf %61, %23 : vector<8x128xf32>
    %150 = arith.addf %148, %149 : vector<8x128xf32>
    %cst_71 = arith.constant 0.000000e+00 : f32
    %151 = vector.broadcast %cst_71 : f32 to vector<8x128xf32>
    %152 = arith.subf %151, %150 : vector<8x128xf32>
    %153 = arith.mulf %152, %152 : vector<8x128xf32>
    %154 = arith.addf %145, %153 : vector<8x128xf32>
    %155 = math.sqrt %154 : vector<8x128xf32>
    %cst_72 = arith.constant 5.000000e-01 : f32
    %156 = vector.broadcast %cst_72 : f32 to vector<8x128xf32>
    %157 = arith.mulf %156, %155 : vector<8x128xf32>
    %158 = arith.addf %127, %157 : vector<8x128xf32>
    %159 = arith.mulf %157, %157 : vector<8x128xf32>
    %160 = arith.addf %128, %159 : vector<8x128xf32>
    %161 = arith.mulf %41, %7 : vector<8x128xf32>
    %162 = arith.mulf %53, %13 : vector<8x128xf32>
    %163 = arith.addf %161, %162 : vector<8x128xf32>
    %164 = arith.mulf %65, %19 : vector<8x128xf32>
    %165 = arith.addf %163, %164 : vector<8x128xf32>
    %cst_73 = arith.constant 0.000000e+00 : f32
    %166 = vector.broadcast %cst_73 : f32 to vector<8x128xf32>
    %167 = arith.subf %166, %165 : vector<8x128xf32>
    %168 = arith.mulf %167, %167 : vector<8x128xf32>
    %169 = arith.mulf %41, %9 : vector<8x128xf32>
    %170 = arith.mulf %53, %15 : vector<8x128xf32>
    %171 = arith.addf %169, %170 : vector<8x128xf32>
    %172 = arith.mulf %65, %21 : vector<8x128xf32>
    %173 = arith.addf %171, %172 : vector<8x128xf32>
    %cst_74 = arith.constant 0.000000e+00 : f32
    %174 = vector.broadcast %cst_74 : f32 to vector<8x128xf32>
    %175 = arith.subf %174, %173 : vector<8x128xf32>
    %176 = arith.mulf %175, %175 : vector<8x128xf32>
    %177 = arith.addf %168, %176 : vector<8x128xf32>
    %178 = arith.mulf %41, %11 : vector<8x128xf32>
    %179 = arith.mulf %53, %17 : vector<8x128xf32>
    %180 = arith.addf %178, %179 : vector<8x128xf32>
    %181 = arith.mulf %65, %23 : vector<8x128xf32>
    %182 = arith.addf %180, %181 : vector<8x128xf32>
    %cst_75 = arith.constant 1.000000e+00 : f32
    %183 = vector.broadcast %cst_75 : f32 to vector<8x128xf32>
    %184 = arith.subf %183, %182 : vector<8x128xf32>
    %185 = arith.mulf %184, %184 : vector<8x128xf32>
    %186 = arith.addf %177, %185 : vector<8x128xf32>
    %187 = math.sqrt %186 : vector<8x128xf32>
    %cst_76 = arith.constant 5.000000e-01 : f32
    %188 = vector.broadcast %cst_76 : f32 to vector<8x128xf32>
    %189 = arith.mulf %188, %187 : vector<8x128xf32>
    %190 = arith.addf %158, %189 : vector<8x128xf32>
    %191 = arith.mulf %189, %189 : vector<8x128xf32>
    %192 = arith.addf %160, %191 : vector<8x128xf32>
    %193 = math.absf %190 : vector<8x128xf32>
    %cst_77 = arith.constant 1.000000e+02 : f32
    %194 = vector.broadcast %cst_77 : f32 to vector<8x128xf32>
    %195 = arith.cmpf ole, %98, %194 : vector<8x128xf32>
    %cst_78 = arith.constant 0.000000e+00 : f32
    %196 = vector.broadcast %cst_78 : f32 to vector<8x128xf32>
    %197 = arith.select %195, %193, %196 : vector<8x128xi1>, vector<8x128xf32>
    %cst_79 = arith.constant 1.000000e+00 : f32
    %198 = vector.broadcast %cst_79 : f32 to vector<8x128xf32>
    %199 = arith.mulf %198, %197 : vector<8x128xf32>
    %cst_80 = arith.constant 5.000000e+00 : f32
    %200 = vector.broadcast %cst_80 : f32 to vector<8x128xf32>
    %201 = arith.mulf %200, %98 : vector<8x128xf32>
    %202 = arith.addf %199, %201 : vector<8x128xf32>
    %c0_81 = arith.constant 0 : index
    %c0_82 = arith.constant 0 : index
    %203 = vector.load %arg5[%c0_81, %c0_82] : memref<8x1xf32, #tpu.memory_space<vmem>>, vector<8x1xf32>
    %204 = vector.broadcast %203 : vector<8x1xf32> to vector<8x128xf32>
    %205 = arith.mulf %202, %204 : vector<8x128xf32>
    %c0_83 = arith.constant 0 : index
    %c0_84 = arith.constant 0 : index
    %206 = vector.load %arg6[%c0_83, %c0_84] : memref<8x128xf32, #tpu.memory_space<vmem>>, vector<8x128xf32>
    tpu.vector_store %arg6[%c0_83, %c0_84], %205 {strides = array<i32>} : memref<8x128xf32, #tpu.memory_space<vmem>>, vector<8x128xf32>,
    %207 = math.sqrt %192 : vector<8x128xf32>
    %c0_85 = arith.constant 0 : index
    %c0_86 = arith.constant 0 : index
    %208 = vector.load %arg7[%c0_85, %c0_86] : memref<8x128xf32, #tpu.memory_space<vmem>>, vector<8x128xf32>
    tpu.vector_store %arg7[%c0_85, %c0_86], %207 {strides = array<i32>} : memref<8x128xf32, #tpu.memory_space<vmem>>, vector<8x128xf32>,
    %c0_87 = arith.constant 0 : index
    %c0_88 = arith.constant 0 : index
    %209 = vector.load %arg8[%c0_87, %c0_88] : memref<8x128xf32, #tpu.memory_space<vmem>>, vector<8x128xf32>
    tpu.vector_store %arg8[%c0_87, %c0_88], %98 {strides = array<i32>} : memref<8x128xf32, #tpu.memory_space<vmem>>, vector<8x128xf32>,
    return
  }
  func.func @transform_0(%arg0: i32) -> (i32, i32, i32) {
    %c0_i32 = arith.constant 0 : i32
    %c0_i32_0 = arith.constant 0 : i32
    %c0_i32_1 = arith.constant 0 : i32
    return %c0_i32, %c0_i32_0, %arg0 : i32, i32, i32
  }
  func.func @transform_1(%arg0: i32) -> (i32, i32, i32) {
    %c0_i32 = arith.constant 0 : i32
    %c0_i32_0 = arith.constant 0 : i32
    %c0_i32_1 = arith.constant 0 : i32
    return %c0_i32, %c0_i32_0, %arg0 : i32, i32, i32
  }
  func.func @transform_2(%arg0: i32) -> (i32, i32, i32) {
    %c0_i32 = arith.constant 0 : i32
    %c0_i32_0 = arith.constant 0 : i32
    %c0_i32_1 = arith.constant 0 : i32
    %c0_i32_2 = arith.constant 0 : i32
    return %c0_i32, %c0_i32_0, %c0_i32_1 : i32, i32, i32
  }
  func.func @transform_3(%arg0: i32) -> (i32, i32, i32) {
    %c0_i32 = arith.constant 0 : i32
    %c0_i32_0 = arith.constant 0 : i32
    %c0_i32_1 = arith.constant 0 : i32
    %c0_i32_2 = arith.constant 0 : i32
    return %c0_i32, %c0_i32_0, %c0_i32_1 : i32, i32, i32
  }
  func.func @transform_4(%arg0: i32) -> (i32, i32) {
    %c0_i32 = arith.constant 0 : i32
    %c0_i32_0 = arith.constant 0 : i32
    %c0_i32_1 = arith.constant 0 : i32
    return %c0_i32, %c0_i32_0 : i32, i32
  }
  func.func @transform_5(%arg0: i32) -> (i32, i32) {
    %c0_i32 = arith.constant 0 : i32
    %c0_i32_0 = arith.constant 0 : i32
    return %c0_i32, %arg0 : i32, i32
  }
  func.func @transform_6(%arg0: i32) -> (i32, i32) {
    %c0_i32 = arith.constant 0 : i32
    %c0_i32_0 = arith.constant 0 : i32
    return %c0_i32, %arg0 : i32, i32
  }
  func.func @transform_7(%arg0: i32) -> (i32, i32) {
    %c0_i32 = arith.constant 0 : i32
    %c0_i32_0 = arith.constant 0 : i32
    return %c0_i32, %arg0 : i32, i32
  }
}

</mosaic_0001>

<bundles_post_ra>
// kernel: tpu_custom_call.1
= control target key start
LH: loop header
LB: loop body
LE: loop exit
PB: predicated region body
PF: predicated region fallthrough
CT: control target
= control target key end

     0   :  { %13 = vsyncpa [#allocation3], 0  ;;  %v466_v3 = vmov 0   ;;  %s621_s0 = inlined_call_operand.vmem [shape: f32[3,8,128], index: 0, kind: input, shape index: {}]   ;;  %s622_s1 = inlined_call_operand.vmem [shape: f32[9,8,128], index: 1, kind: input, shape index: {}]   ;;  %s623_s2 = inlined_call_operand.vmem [shape: f32[3,8,1], index: 2, kind: input, shape index: {}]   ;;  %s624_s3 = inlined_call_operand.vmem [shape: f32[9,8,1], index: 3, kind: input, shape index: {}]   ;;  %s625_s4 = inlined_call_operand.vmem [shape: f32[8,1], index: 4, kind: input, shape index: {}]   ;;  %s626_s5 = inlined_call_operand.hbm [shape: f32[8,128], index: 5, kind: output, shape index: {0}]   ;;  %s627_s6 = inlined_call_operand.hbm [shape: f32[8,128], index: 6, kind: output, shape index: {1}]   ;;  %s628_s7 = inlined_call_operand.hbm [shape: f32[8,128], index: 7, kind: output, shape index: {2}]  }
   0x1   :  { %v366_v0 = vld [vmem:[%s624_s3 + $0x10] sm:$0xff]  ;;  %v367_v1 = vld [vmem:[%s624_s3 + $0x18] sm:$0xff]  ;;  %v52_v2 = vld [vmem:[%s624_s3] sm:$0xff]  ;;  %379 = vset.pattern.permute.xlu2 %v466_v3  ;;  %378 = vset.pattern.permute.xlu1 %v466_v3 }
   0x2   :  { %377 = vset.pattern.permute.xlu0 %v466_v3  ;;  %69 = vperm.xlu2 %379, %v366_v0  }
   0x3   :  { %76 = vperm.xlu1 %378, %v367_v1   ;;  %55 = vperm.xlu0 %377, %v52_v2  }
   0x4   :  { %14 = vsyncpa [#allocation5], 0  ;;  %v369_v4 = vld [vmem:[%s624_s3 + $0x28] sm:$0xff]  ;;  %v368_v5 = vld [vmem:[%s624_s3 + $0x20] sm:$0xff]  ;;  %s313_s26 = sshll.u32 %s626_s5, 4  ;;  %s468_s27 = smov [#allocation4]   ;;  %s314_s26 = int_to_ptr.hbm [resolvable:$true] %s313_s26 }
   0x5   :  { %v365_v6 = vld [vmem:[%s624_s3 + $0x8] sm:$0xff]  ;;  %v372_v7 = vld [vmem:[%s624_s3 + $0x40] sm:$0xff]  ;;  %v371_v8 = vld [vmem:[%s624_s3 + $0x38] sm:$0xff]  ;;  %s322_s28 = sshll.u32 %s468_s27, 4  ;;  %s324_s8 = sshll.u32 %s627_s6, 4  ;;  %s323_s28 = int_to_ptr.vmem [resolvable:$true] %s322_s28  ;;  %s325_s8 = int_to_ptr.hbm [resolvable:$true] %s324_s8 }
   0x6   :  { %v370_v9 = vld [vmem:[%s624_s3 + $0x30] sm:$0xff]  ;;  %v363_v11 = vld [vmem:[%s623_s2 + $0x8] sm:$0xff]  ;;  %v47_v12 = vld [vmem:[%s623_s2] sm:$0xff]  ;;  %s469_s5 = smov [#allocation6]   ;;  %s335_s10 = sshll.u32 %s628_s7, 4  ;;  %s336_s10 = int_to_ptr.hbm [resolvable:$true] %s335_s10 }
   0x7   :  { %v364_v10 = vld [vmem:[%s623_s2 + $0x10] sm:$0xff]  ;;  %v284_v13 = vld [vmem:[%s625_s4] sm:$0xff]  ;;  %v355_v16 = vld [vmem:[%s622_s1 + $0x8] sm:$0xff]  ;;  %s333_s2 = sshll.u32 %s469_s5, 4  ;;  %s334_s2 = int_to_ptr.vmem [resolvable:$true] %s333_s2 }
   0x8   :  { %v30_v15 = vld [vmem:[%s622_s1] sm:$0xff]  ;;  %v356_v17 = vld [vmem:[%s622_s1 + $0x10] sm:$0xff]  ;;  %v357_v19 = vld [vmem:[%s622_s1 + $0x18] sm:$0xff] }
   0x9   :  { %v358_v20 = vld [vmem:[%s622_s1 + $0x20] sm:$0xff]  ;;  %v359_v21 = vld [vmem:[%s622_s1 + $0x28] sm:$0xff]  ;;  %v570_v28 = vld [vmem:[%s622_s1 + $0x30] sm:$0xff] }
   0xa   :  { %90 = vperm.xlu2 %379, %v369_v4   ;;  %v575_v29 = vld [vmem:[%s622_s1 + $0x38] sm:$0xff]  ;;  %v580_v30 = vld [vmem:[%s622_s1 + $0x40] sm:$0xff]  ;;  %v353_v51 = vld [vmem:[%s621_s0 + $0x8] sm:$0xff] }
   0xb   :  { %83 = vperm.xlu1 %378, %v368_v5   ;;  %62 = vperm.xlu0 %377, %v365_v6   ;;  %v25_v50 = vld [vmem:[%s621_s0] sm:$0xff]  ;;  %v140_v53 = vmul.f32 %v359_v21, %v353_v51  ;;  %v354_v55 = vld [vmem:[%s621_s0 + $0x10] sm:$0xff]  ;;  %v127_v61 = vmul.f32 %v358_v20, %v353_v51  ;;  %v115_v1 = vmul.f32 %v357_v19, %v353_v51  ;;  %s467_s0 = smov [#allocation2]  }
   0xc   :  { %v139_v52 = vmul.f32 %v356_v17, %v25_v50  ;;  %v142_v59 = vmul.f32 %v580_v30, %v354_v55  ;;  %v126_v60 = vmul.f32 %v355_v16, %v25_v50  ;;  %v114_v0 = vmul.f32 %v30_v15, %v25_v50  ;;  %s311_s24 = sshll.u32 %s467_s0, 4  ;;  %s312_s24 = int_to_ptr.vmem [resolvable:$true] %s311_s24 }
   0xe   :  { %v141_v56 = vadd.f32 %v140_v53, %v139_v52 }
  0x12   :  { %111 = vperm.xlu2 %379, %v372_v7  }
  0x13   :  { %104 = vperm.xlu1 %378, %v371_v8   ;;  %97 = vperm.xlu0 %377, %v370_v9  }
  0x1a   :  { %146 = vperm.xlu2 %379, %v364_v10  }
  0x1b   :  { %133 = vperm.xlu1 %378, %v363_v11   ;;  %121 = vperm.xlu0 %377, %v47_v12   ;;  %v143_v12 = vadd.f32 %v142_v59, %v141_v56 }
  0x23   :  { %287 = vperm.xlu0 %377, %v284_v13   ;;  %v128_v13 = vadd.f32 %v127_v61, %v126_v60 }
  0x5c   :  { %v70_v14 = vpop.permute.xlu2 %69 }
  0x5d   :  { %v240_v22 = vmul.f32 %v70_v14, %v30_v15  ;;  %v247_v23 = vmul.f32 %v355_v16, %v70_v14  ;;  %v255_v24 = vmul.f32 %v356_v17, %v70_v14 }
  0x64   :  { %v91_v18 = vpop.permute.xlu2 %90 }
  0x65   :  { %v241_v25 = vmul.f32 %v357_v19, %v91_v18  ;;  %v248_v26 = vmul.f32 %v358_v20, %v91_v18  ;;  %v256_v27 = vmul.f32 %v359_v21, %v91_v18 }
  0x67   :  { %v242_v31 = vadd.f32 %v241_v25, %v240_v22  ;;  %v249_v32 = vadd.f32 %v248_v26, %v247_v23  ;;  %v257_v33 = vadd.f32 %v256_v27, %v255_v24  ;;  %v129_v22 = vmul.f32 %v575_v29, %v354_v55 }
  0x68   :  { %v116_v23 = vadd.f32 %v115_v1, %v114_v0  ;;  %v117_v24 = vmul.f32 %v570_v28, %v354_v55 }
  0x6c   :  { %v112_v34 = vpop.permute.xlu2 %111 }
  0x6d   :  { %v243_v35 = vmul.f32 %v570_v28, %v112_v34  ;;  %v250_v36 = vmul.f32 %v575_v29, %v112_v34  ;;  %v258_v37 = vmul.f32 %v580_v30, %v112_v34 }
  0x6f   :  { %v244_v38 = vadd.f32 %v243_v35, %v242_v31  ;;  %v251_v39 = vadd.f32 %v250_v36, %v249_v32  ;;  %v259_v40 = vadd.f32 %v258_v37, %v257_v33 }
  0x71   :  { %v245_v41 = vsub.f32 0.0, %v244_v38  ;;  %v252_v42 = vsub.f32 0.0, %v251_v39  ;;  %v260_v43 = vsub.f32 1.0, %v259_v40 }
  0x73   :  { %v246_v44 = vmul.f32 %v245_v41, %v245_v41  ;;  %v253_v45 = vmul.f32 %v252_v42, %v252_v42  ;;  %v261_v49 = vmul.f32 %v260_v43, %v260_v43  ;;  %v130_v42 = vadd.f32 %v129_v22, %v128_v13 }
  0x74   :  { %v118_v43 = vadd.f32 %v117_v24, %v116_v23 }
  0x75   :  { %v77_v46 = vpop.permute.xlu1 %76  ;;  %v56_v47 = vpop.permute.xlu0 %55  ;;  %v254_v48 = vadd.f32 %v253_v45, %v246_v44 }
  0x76   :  { %v165_v62 = vmul.f32 %v357_v19, %v77_v46  ;;  %v172_v63 = vmul.f32 %v358_v20, %v77_v46  ;;  %v164_v2 = vmul.f32 %v56_v47, %v30_v15  ;;  %v171_v3 = vmul.f32 %v355_v16, %v56_v47  ;;  %v147_v44 = vpop.permute.xlu2 %146 }
  0x77   :  { %v591_v54 = vadd.f32 %v261_v49, %v254_v48  ;;  %v180_v10 = vmul.f32 %v359_v21, %v77_v46  ;;  %v179_v11 = vmul.f32 %v356_v17, %v56_v47  ;;  %v149_v52 = vadd.f32 %v147_v44, %v143_v12 }
  0x78   :  { %v166_v18 = vadd.f32 %v165_v62, %v164_v2  ;;  %v173_v25 = vadd.f32 %v172_v63, %v171_v3 }
  0x79   :  { %380 = vrsqrt.f32 %v591_v54  ;;  %v181_v32 = vadd.f32 %v180_v10, %v179_v11  ;;  %vm270_vm0 = vcmp.eq.f32.partialorder %v591_v54, inf  ;;  %vm272_vm1 = vcmp.eq.f32.partialorder %v591_v54, 0.0 }
  0x7d   :  { %v84_v57 = vpop.permute.xlu1 %83  ;;  %v63_v58 = vpop.permute.xlu0 %62 }
  0x7e   :  { %v202_v4 = vmul.f32 %v357_v19, %v84_v57  ;;  %v209_v5 = vmul.f32 %v358_v20, %v84_v57  ;;  %v217_v6 = vmul.f32 %v359_v21, %v84_v57  ;;  %v201_v7 = vmul.f32 %v63_v58, %v30_v15 }
  0x7f   :  { %v208_v8 = vmul.f32 %v355_v16, %v63_v58  ;;  %v216_v9 = vmul.f32 %v356_v17, %v63_v58  ;;  %v381_v14 = vpop.eup %380 }
  0x80   :  { %v203_v26 = vadd.f32 %v202_v4, %v201_v7  ;;  %v264_v35 = vmul.f32 %v381_v14, %v591_v54  ;;  %v150_v4 = vmul.f32 %v149_v52, %v149_v52 }
  0x81   :  { %v210_v27 = vadd.f32 %v209_v5, %v208_v8  ;;  %v218_v19 = vadd.f32 %v217_v6, %v216_v9 }
  0x82   :  { %v265_v51 = vmul.f32 %v381_v14, %v264_v35 }
  0x84   :  { %v266_v2 = vmul.f32 0.5, %v265_v51 }
  0x85   :  { %v105_v20 = vpop.permute.xlu1 %104  ;;  %v98_v31 = vpop.permute.xlu0 %97 }
  0x86   :  { %v204_v15 = vmul.f32 %v570_v28, %v105_v20  ;;  %v211_v16 = vmul.f32 %v575_v29, %v105_v20  ;;  %v219_v17 = vmul.f32 %v580_v30, %v105_v20  ;;  %v167_v21 = vmul.f32 %v570_v28, %v98_v31 }
  0x87   :  { %v174_v33 = vmul.f32 %v575_v29, %v98_v31  ;;  %v182_v34 = vmul.f32 %v580_v30, %v98_v31  ;;  %v267_v7 = vsub.f32 1.5, %v266_v2 }
  0x88   :  { %v205_v36 = vadd.f32 %v204_v15, %v203_v26  ;;  %v212_v37 = vadd.f32 %v211_v16, %v210_v27  ;;  %v220_v38 = vadd.f32 %v219_v17, %v218_v19  ;;  %v168_v39 = vadd.f32 %v167_v21, %v166_v18 }
  0x89   :  { %v175_v40 = vadd.f32 %v174_v33, %v173_v25  ;;  %v183_v41 = vadd.f32 %v182_v34, %v181_v32  ;;  %v268_v9 = vmul.f32 %v381_v14, %v267_v7  ;;  %v273_v16 = vand.u32 2147483648, %v591_v54 }
  0x8a   :  { %v206_v45 = vsub.f32 0.0, %v205_v36  ;;  %v213_v46 = vsub.f32 1.0, %v212_v37  ;;  %v221_v47 = vsub.f32 0.0, %v220_v38  ;;  %v169_v28 = vsub.f32 1.0, %v168_v39 }
  0x8b   :  { %v176_v48 = vsub.f32 0.0, %v175_v40  ;;  %v184_v49 = vsub.f32 0.0, %v183_v41  ;;  %v269_v23 = vmul.f32 %v268_v9, %v591_v54 }
  0x8c   :  { %v207_v29 = vmul.f32 %v206_v45, %v206_v45  ;;  %v214_v50 = vmul.f32 %v213_v46, %v213_v46  ;;  %v170_v30 = vmul.f32 %v169_v28, %v169_v28  ;;  %v222_v58 = vmul.f32 %v221_v47, %v221_v47 }
  0x8d   :  { %v177_v53 = vmul.f32 %v176_v48, %v176_v48  ;;  %v134_v55 = vpop.permute.xlu1 %133  ;;  %v122_v56 = vpop.permute.xlu0 %121  ;;  %v185_v62 = vmul.f32 %v184_v49, %v184_v49  ;;  %v271_v31 = vsel %vm270_vm0, %v591_v54, %v269_v23 }
  0x8e   :  { %v215_v57 = vadd.f32 %v214_v50, %v207_v29  ;;  %v136_v59 = vadd.f32 %v134_v55, %v130_v42  ;;  %v124_v60 = vadd.f32 %v122_v56, %v118_v43  ;;  %v274_v33 = vsel %vm272_vm1, %v273_v16, %v271_v31 }
  0x8f   :  { %v178_v61 = vadd.f32 %v177_v53, %v170_v30  ;;  %v275_v45 = vmul.f32 0.5, %v274_v33 }
  0x90   :  { %v223_v63 = vadd.f32 %v222_v58, %v215_v57  ;;  %v137_v0 = vmul.f32 %v136_v59, %v136_v59  ;;  %v125_v1 = vmul.f32 %v124_v60, %v124_v60 }
  0x91   :  { %v186_v3 = vadd.f32 %v185_v62, %v178_v61  ;;  %v277_v30 = vmul.f32 %v275_v45, %v275_v45 }
  0x92   :  { %382 = vrsqrt.f32 %v223_v63  ;;  %v138_v5 = vadd.f32 %v137_v0, %v125_v1  ;;  %vm231_vm2 = vcmp.eq.f32.partialorder %v223_v63, inf  ;;  %vm233_vm3 = vcmp.eq.f32.partialorder %v223_v63, 0.0 }
  0x93   :  { %384 = vrsqrt.f32 %v186_v3  ;;  %v234_v35 = vand.u32 2147483648, %v223_v63  ;;  %vm194_vm4 = vcmp.eq.f32.partialorder %v186_v3, inf  ;;  %v197_v37 = vand.u32 2147483648, %v186_v3 }
  0x94   :  { %v151_v6 = vadd.f32 %v150_v4, %v138_v5  ;;  %vm196_vm5 = vcmp.eq.f32.partialorder %v186_v3, 0.0 }
  0x95   :  { %v288_v57 = vpop.permute.xlu0 %287 }
  0x96   :  { %386 = vrsqrt.f32 %v151_v6  ;;  %vm159_vm6 = vcmp.eq.f32.partialorder %v151_v6, inf  ;;  %v162_v44 = vand.u32 2147483648, %v151_v6  ;;  %vm161_vm7 = vcmp.eq.f32.partialorder %v151_v6, 0.0 }
  0x98   :  { %v383_v8 = vpop.eup %382 }
  0x99   :  { %v385_v10 = vpop.eup %384  ;;  %v225_v11 = vmul.f32 %v383_v8, %v223_v63 }
  0x9a   :  { %v188_v12 = vmul.f32 %v385_v10, %v186_v3 }
  0x9b   :  { %v226_v13 = vmul.f32 %v383_v8, %v225_v11 }
  0x9c   :  { %v387_v18 = vpop.eup %386  ;;  %v189_v22 = vmul.f32 %v385_v10, %v188_v12 }
  0x9d   :  { %v153_v24 = vmul.f32 %v387_v18, %v151_v6  ;;  %v227_v25 = vmul.f32 0.5, %v226_v13 }
  0x9e   :  { %v190_v26 = vmul.f32 0.5, %v189_v22 }
  0x9f   :  { %v154_v27 = vmul.f32 %v387_v18, %v153_v24  ;;  %v228_v19 = vsub.f32 1.5, %v227_v25 }
  0xa0   :  { %v191_v20 = vsub.f32 1.5, %v190_v26 }
  0xa1   :  { %v155_v15 = vmul.f32 0.5, %v154_v27  ;;  %v229_v14 = vmul.f32 %v383_v8, %v228_v19 }
  0xa2   :  { %v192_v17 = vmul.f32 %v385_v10, %v191_v20 }
  0xa3   :  { %v156_v21 = vsub.f32 1.5, %v155_v15  ;;  %v230_v32 = vmul.f32 %v229_v14, %v223_v63 }
  0xa4   :  { %v193_v34 = vmul.f32 %v192_v17, %v186_v3 }
  0xa5   :  { %v157_v36 = vmul.f32 %v387_v18, %v156_v21  ;;  %v232_v38 = vsel %vm231_vm2, %v223_v63, %v230_v32 }
  0xa6   :  { %v195_v39 = vsel %vm194_vm4, %v186_v3, %v193_v34  ;;  %v235_v40 = vsel %vm233_vm3, %v234_v35, %v232_v38 }
  0xa7   :  { %v158_v41 = vmul.f32 %v157_v36, %v151_v6  ;;  %v198_v42 = vsel %vm196_vm5, %v197_v37, %v195_v39  ;;  %v236_v43 = vmul.f32 0.5, %v235_v40 }
  0xa8   :  { %v199_v54 = vmul.f32 0.5, %v198_v42 }
  0xa9   :  { %v160_v46 = vsel %vm159_vm6, %v151_v6, %v158_v41  ;;  %v238_v47 = vmul.f32 %v236_v43, %v236_v43 }
  0xaa   :  { %v163_v28 = vsel %vm161_vm7, %v162_v44, %v160_v46  ;;  %v200_v48 = vmul.f32 %v199_v54, %v199_v54  ;;  %v237_v49 = vadd.f32 %v236_v43, %v199_v54 }
  0xab   :  { %305 = vst [vmem:[#allocation6] sm:$0xff] %v163_v28  ;;  %vm280_vm8 = vcmp.le.f32.partialorder %v163_v28, 100.0  ;;  %v282_v53 = vmul.f32 5.0, %v163_v28 }
  0xac   :  { %v239_v29 = vadd.f32 %v238_v47, %v200_v48  ;;  %v276_v50 = vadd.f32 %v275_v45, %v237_v49 }
  0xae   :  { %v278_v51 = vadd.f32 %v277_v30, %v239_v29  ;;  %v279_v52 = vand.u32 2147483647, %v276_v50 }
  0xb0   :  { %v281_v55 = vsel %vm280_vm8, %v279_v52, 0.0  ;;  %388 = vrsqrt.f32 %v278_v51  ;;  %vm299_vm9 = vcmp.eq.f32.partialorder %v278_v51, inf  ;;  %v302_v2 = vand.u32 2147483648, %v278_v51 }
  0xb1   :  { %v283_v56 = vadd.f32 %v282_v53, %v281_v55  ;;  %vm301_vm10 = vcmp.eq.f32.partialorder %v278_v51, 0.0 }
  0xb3   :  { %v290_v58 = vmul.f32 %v288_v57, %v283_v56 }
  0xb5   :  { %291 = vst [vmem:[#allocation2] sm:$0xff] %v290_v58 }
  0xb6   :  { %v389_v59 = vpop.eup %388  ;;  %316 = dma.vmem_to_hbm [thread:$0]  %s312_s24, 128, %s314_s26, [#allocation3]  }
  0xb7   :  { %v293_v60 = vmul.f32 %v389_v59, %v278_v51 }
  0xb9   :  { %v294_v61 = vmul.f32 %v389_v59, %v293_v60 }
  0xbb   :  { %v295_v62 = vmul.f32 0.5, %v294_v61 }
  0xbd   :  { %v296_v63 = vsub.f32 1.5, %v295_v62 }
  0xbf   :  { %v297_v0 = vmul.f32 %v389_v59, %v296_v63 }
  0xc1   :  { %v298_v1 = vmul.f32 %v297_v0, %v278_v51 }
  0xc3   :  { %v300_v3 = vsel %vm299_vm9, %v278_v51, %v298_v1 }
  0xc4   :  { %v303_v4 = vsel %vm301_vm10, %v302_v2, %v300_v3 }
  0xc5   :  { %304 = vst [vmem:[#allocation4] sm:$0xff] %v303_v4 }
  0xc6   :  { %327 = dma.vmem_to_hbm [thread:$0]  %s323_s28, 128, %s325_s8, [#allocation5]  }
  0xc7   :  { %338 = dma.vmem_to_hbm [thread:$0]  %s334_s2, 128, %s336_s10, [#allocation5]  }
  0xc8   :  { %462 = dma.done.wait [#allocation3], 128  }
  0xc9   :  { %463 = vsyncadd [#allocation3], 4294967168 }
  0xca   :  { %464 = dma.done.wait [#allocation5], 256  }
  0xcb   :  { %465 = vsyncadd [#allocation5], 4294967040 }
  0xcc   :  { %351 = vsyncpa [#allocation3], 1 }
  0xcd   :  { %352 = vsyncpa [#allocation5], 1 }

</bundles_post_ra>
